<compile_context>
chip_gen: v7x
topology: tpu7x:2x2x1
jax: 0.10.0
libtpu: 0.0.40
codegen_flags: <defaults>
</compile_context>

<pallas_src>
import jax
import jax.numpy as jnp
from jax.experimental import pallas as pl
from jax.experimental.pallas import tpu as pltpu


def encoder_kernel(x_ref, w1_ref, b1_ref, w2_ref, b2_ref, o_ref):
    # fc1: [tm, in](bf16) @ [in, hid](bf16) -> [tm, hid] with f32 accumulation.
    h = jnp.dot(x_ref[...], w1_ref[...], preferred_element_type=jnp.float32)
    h = jnp.maximum(h + b1_ref[...], 0.0)            # bias + ReLU (f32, VPU)
    # dropout(p=0.2) in eval mode == identity
    # fc2: [tm, hid](bf16) @ [hid, out](bf16) -> [tm, out] with f32 accumulation.
    y = jnp.dot(h.astype(jnp.bfloat16), w2_ref[...],
                preferred_element_type=jnp.float32)
    o_ref[...] = (y + b2_ref[...]).astype(o_ref.dtype)


def _cdiv(a, b):
    return -(-a // b)


def _round_up(x, m):
    return ((x + m - 1) // m) * m


def _choose_tile(batch, tm_max):
    """Balanced batch tile: multiple of 16, <= tm_max, >=2 tiles for v7x."""
    n_tiles = _cdiv(batch, tm_max)
    if n_tiles == 1 and batch > 256:
        n_tiles = 2                      # keep both v7x TensorCores busy
    tm = _round_up(_cdiv(batch, n_tiles), 16)
    if tm > batch:                       # tiny batch: single full-extent block
        tm = batch                       # block == full array dim is always legal
    return tm


def encoder_forward(x, w1, b1, w2, b2, *, tm=2048, min_kernel_batch=512,
                    force_kernel=False):
    """x: [B, input_dim]; w1: [input_dim, 128]; b1: [128]; w2: [128, out]; b2: [out]."""
    B, in_dim = x.shape
    hid = w1.shape[1]
    out_dim = w2.shape[1]
    out_dtype = x.dtype

    # Small-batch bypass: at a few hundred rows or less, kernel dispatch and
    # pipeline prologue dominate; plain fused XLA is as fast or faster.
    if not force_kernel and B < min_kernel_batch:
        h = jnp.maximum(x @ w1 + b1, 0.0)
        return (h @ w2 + b2).astype(out_dtype)

    tm_eff = _choose_tile(B, tm)
    grid = (_cdiv(B, tm_eff),)

    # bf16 MXU operands (the x cast is the ONLY wrapper-side pass over x, and
    # is a no-op when the caller already supplies bf16); f32 biases.
    x_bf = x.astype(jnp.bfloat16)
    w1_bf = w1.astype(jnp.bfloat16)
    w2_bf = w2.astype(jnp.bfloat16)
    b1r = b1.astype(jnp.float32).reshape(1, hid)
    b2r = b2.astype(jnp.float32).reshape(1, out_dim)

    flops = 2 * B * (in_dim * hid + hid * out_dim)
    bytes_accessed = (x_bf.size * 2 + w1_bf.size * 2 + w2_bf.size * 2
                      + b1r.size * 4 + b2r.size * 4
                      + B * out_dim * jnp.dtype(out_dtype).itemsize)

    return pl.pallas_call(
        encoder_kernel,
        out_shape=jax.ShapeDtypeStruct((B, out_dim), out_dtype),
        grid_spec=pltpu.PrefetchScalarGridSpec(
            num_scalar_prefetch=0,
            grid=grid,
            in_specs=[
                pl.BlockSpec((tm_eff, in_dim), lambda i: (i, 0)),  # x (streamed)
                pl.BlockSpec((in_dim, hid), lambda i: (0, 0)),     # w1 (grid-invariant)
                pl.BlockSpec((1, hid), lambda i: (0, 0)),          # b1
                pl.BlockSpec((hid, out_dim), lambda i: (0, 0)),    # w2 (grid-invariant)
                pl.BlockSpec((1, out_dim), lambda i: (0, 0)),      # b2
            ],
            out_specs=pl.BlockSpec((tm_eff, out_dim), lambda i: (i, 0)),
        ),
        compiler_params=pltpu.CompilerParams(
            dimension_semantics=("parallel",),   # batch tiles shard across v7x TCs
        ),
        cost_estimate=pl.CostEstimate(
            flops=flops, transcendentals=0, bytes_accessed=bytes_accessed),
    )(x_bf, w1_bf, b1r, w2_bf, b2r)


def init_params(key, input_dim=256, hidden_dim=128, output_dim=64):
    """Deterministic PyTorch-style init: U(-1/sqrt(fan_in), 1/sqrt(fan_in))."""
    k1, k2, k3, k4 = jax.random.split(key, 4)
    bound1 = 1.0 / (input_dim ** 0.5)
    bound2 = 1.0 / (hidden_dim ** 0.5)
    # Stored transposed relative to torch ([in, out]) so the kernel does x @ W.
    w1 = jax.random.uniform(k1, (input_dim, hidden_dim), jnp.float32, -bound1, bound1)
    b1 = jax.random.uniform(k2, (hidden_dim,), jnp.float32, -bound1, bound1)
    w2 = jax.random.uniform(k3, (hidden_dim, output_dim), jnp.float32, -bound2, bound2)
    b2 = jax.random.uniform(k4, (output_dim,), jnp.float32, -bound2, bound2)
    return w1, b1, w2, b2


if __name__ == "__main__":
    key = jax.random.PRNGKey(0)
    k_x, k_x2, k_p = jax.random.split(key, 3)

    input_dim, hidden_dim, output_dim = 256, 128, 64
    w1, b1, w2, b2 = init_params(k_p, input_dim, hidden_dim, output_dim)

    def ref(xv):
        return jnp.maximum(xv @ w1 + b1, 0.0) @ w2 + b2

    # 1) Small demo batch forced through the Pallas kernel (single full-extent tile).
    x_small = jax.random.normal(k_x, (8, input_dim), jnp.float32)
    out_small = jax.block_until_ready(
        encoder_forward(x_small, w1, b1, w2, b2, force_kernel=True))
    assert out_small.shape == (8, output_dim)
    assert jnp.allclose(out_small, ref(x_small), atol=3e-2, rtol=3e-2), (
        float(jnp.max(jnp.abs(out_small - ref(x_small)))))

    # 2) Ragged multi-tile batch: exercises cdiv grid, OOB masking on the last
    #    tile, and the >=2-step split for the parallel batch axis.
    x_big = jax.random.normal(k_x2, (600, input_dim), jnp.float32)
    out_big = jax.block_until_ready(encoder_forward(x_big, w1, b1, w2, b2))
    assert out_big.shape == (600, output_dim)
    assert jnp.allclose(out_big, ref(x_big), atol=4e-2, rtol=4e-2), (
        float(jnp.max(jnp.abs(out_big - ref(x_big)))))

    # 3) Small-batch bypass path (plain XLA, f32).
    out_bypass = jax.block_until_ready(encoder_forward(x_small, w1, b1, w2, b2))
    assert jnp.allclose(out_bypass, ref(x_small), atol=1e-5, rtol=1e-5)

    print("KERNEL_OK")
</pallas_src>

<mosaic_0001>
module attributes {stable_mosaic.version = 11 : i64} {
  func.func @encoder_kernel(%arg0: i32, %arg1: memref<8x256xbf16, #tpu.memory_space<vmem>>, %arg2: memref<256x128xbf16, #tpu.memory_space<vmem>>, %arg3: memref<1x128xf32, #tpu.memory_space<vmem>>, %arg4: memref<128x64xbf16, #tpu.memory_space<vmem>>, %arg5: memref<1x64xf32, #tpu.memory_space<vmem>>, %arg6: memref<8x64xf32, #tpu.memory_space<vmem>>) attributes {dimension_semantics = [#tpu.dimension_semantics<parallel>], iteration_bounds = array<i64: 1>, scalar_prefetch = 0 : i64, scratch_operands = 0 : i64, tpu.core_type = #tpu.core_type<tc>, window_params = [{transform_indices = @transform_0, window_bounds = array<i64: 8, 256>}, {pipeline_mode = #tpu.pipeline_mode<synchronous>, transform_indices = @transform_1, window_bounds = array<i64: 256, 128>}, {pipeline_mode = #tpu.pipeline_mode<synchronous>, transform_indices = @transform_2, window_bounds = array<i64: 1, 128>}, {pipeline_mode = #tpu.pipeline_mode<synchronous>, transform_indices = @transform_3, window_bounds = array<i64: 128, 64>}, {pipeline_mode = #tpu.pipeline_mode<synchronous>, transform_indices = @transform_4, window_bounds = array<i64: 1, 64>}, {transform_indices = @transform_5, window_bounds = array<i64: 8, 64>}]} {
    %c0 = arith.constant 0 : index
    %c0_0 = arith.constant 0 : index
    %0 = vector.load %arg1[%c0, %c0_0] : memref<8x256xbf16, #tpu.memory_space<vmem>>, vector<8x256xbf16>
    %c0_1 = arith.constant 0 : index
    %c0_2 = arith.constant 0 : index
    %1 = vector.load %arg2[%c0_1, %c0_2] : memref<256x128xbf16, #tpu.memory_space<vmem>>, vector<256x128xbf16>
    %cst = arith.constant dense<0.000000e+00> : vector<8x128xf32>
    %2 = tpu.matmul %0, %1, %cst {dimension_numbers = #tpu.dot_dimension_numbers<[1], [0], [0], [1], [0, 0, 1, 1], [], []>} : vector<8x256xbf16>, vector<256x128xbf16>, vector<8x128xf32> -> vector<8x128xf32>
    %c0_3 = arith.constant 0 : index
    %c0_4 = arith.constant 0 : index
    %3 = vector.load %arg3[%c0_3, %c0_4] : memref<1x128xf32, #tpu.memory_space<vmem>>, vector<1x128xf32>
    %4 = vector.broadcast %3 : vector<1x128xf32> to vector<8x128xf32>
    %5 = arith.addf %2, %4 : vector<8x128xf32>
    %cst_5 = arith.constant 0.000000e+00 : f32
    %6 = vector.broadcast %cst_5 : f32 to vector<8x128xf32>
    %7 = arith.maximumf %5, %6 : vector<8x128xf32>
    %8 = arith.truncf %7 : vector<8x128xf32> to vector<8x128xbf16>
    %c0_6 = arith.constant 0 : index
    %c0_7 = arith.constant 0 : index
    %9 = vector.load %arg4[%c0_6, %c0_7] : memref<128x64xbf16, #tpu.memory_space<vmem>>, vector<128x64xbf16>
    %cst_8 = arith.constant dense<0.000000e+00> : vector<8x64xf32>
    %10 = tpu.matmul %8, %9, %cst_8 {dimension_numbers = #tpu.dot_dimension_numbers<[1], [0], [0], [1], [0, 0, 1, 1], [], []>} : vector<8x128xbf16>, vector<128x64xbf16>, vector<8x64xf32> -> vector<8x64xf32>
    %c0_9 = arith.constant 0 : index
    %c0_10 = arith.constant 0 : index
    %11 = vector.load %arg5[%c0_9, %c0_10] : memref<1x64xf32, #tpu.memory_space<vmem>>, vector<1x64xf32>
    %12 = vector.broadcast %11 : vector<1x64xf32> to vector<8x64xf32>
    %13 = arith.addf %10, %12 : vector<8x64xf32>
    %c0_11 = arith.constant 0 : index
    %c0_12 = arith.constant 0 : index
    %14 = vector.load %arg6[%c0_11, %c0_12] : memref<8x64xf32, #tpu.memory_space<vmem>>, vector<8x64xf32>
    tpu.vector_store %arg6[%c0_11, %c0_12], %13 {strides = array<i32>} : memref<8x64xf32, #tpu.memory_space<vmem>>, vector<8x64xf32>,
    return
  }
  func.func @transform_0(%arg0: i32) -> (i32, i32) {
    %c0_i32 = arith.constant 0 : i32
    %c0_i32_0 = arith.constant 0 : i32
    return %arg0, %c0_i32 : i32, i32
  }
  func.func @transform_1(%arg0: i32) -> (i32, i32) {
    %c0_i32 = arith.constant 0 : i32
    %c0_i32_0 = arith.constant 0 : i32
    %c0_i32_1 = arith.constant 0 : i32
    return %c0_i32, %c0_i32_0 : i32, i32
  }
  func.func @transform_2(%arg0: i32) -> (i32, i32) {
    %c0_i32 = arith.constant 0 : i32
    %c0_i32_0 = arith.constant 0 : i32
    %c0_i32_1 = arith.constant 0 : i32
    return %c0_i32, %c0_i32_0 : i32, i32
  }
  func.func @transform_3(%arg0: i32) -> (i32, i32) {
    %c0_i32 = arith.constant 0 : i32
    %c0_i32_0 = arith.constant 0 : i32
    %c0_i32_1 = arith.constant 0 : i32
    return %c0_i32, %c0_i32_0 : i32, i32
  }
  func.func @transform_4(%arg0: i32) -> (i32, i32) {
    %c0_i32 = arith.constant 0 : i32
    %c0_i32_0 = arith.constant 0 : i32
    %c0_i32_1 = arith.constant 0 : i32
    return %c0_i32, %c0_i32_0 : i32, i32
  }
  func.func @transform_5(%arg0: i32) -> (i32, i32) {
    %c0_i32 = arith.constant 0 : i32
    %c0_i32_0 = arith.constant 0 : i32
    return %arg0, %c0_i32 : i32, i32
  }
}

</mosaic_0001>

<bundles_post_ra>
// kernel: tpu_custom_call.1
= control target key start
LH: loop header
LB: loop body
LE: loop exit
PB: predicated region body
PF: predicated region fallthrough
CT: control target
= control target key end

     0   :  { %10 = vsyncpa [#allocation3], 0  ;;  %s610_s0 = inlined_call_operand.vmem [shape: bf16[8,256], index: 0, kind: input, shape index: {}]   ;;  %s611_s1 = inlined_call_operand.hbm [shape: bf16[256,128], index: 1, kind: input, shape index: {}]   ;;  %s612_s2 = inlined_call_operand.vmem [shape: f32[1,128], index: 2, kind: input, shape index: {}]   ;;  %s613_s3 = inlined_call_operand.vmem [shape: bf16[128,64], index: 3, kind: input, shape index: {}]   ;;  %s614_s4 = inlined_call_operand.vmem [shape: f32[1,64], index: 4, kind: input, shape index: {}]   ;;  %s615_s5 = inlined_call_operand.hbm [shape: f32[8,64], index: 5, kind: output, shape index: {}]  }
   0x1   :  { %11 = vsyncpa [#allocation4], 0  ;;  %s508_s18 = smov [#allocation2]   ;;  %s460_s22 = scalar_lea.hbm %s611_s1, 2048 }
   0x2   :  { %s19_s19 = sshll.u32 %s508_s18, 4  ;;  %p461_p0 = scmp.ne.s32.totalorder %s611_s1, %s460_s22  ;;  %s20_s19 = int_to_ptr.vmem [resolvable:$true] %s19_s19 }
   0x3   :  { %p464_p1 = scmp.lt.u32.totalorder %s460_s22, %s611_s1 }
   0x5   :  { %p466_p2 = pnand %p464_p1, %p461_p0 }
   0x7   :  { %469 = shalt.err (!%p466_p2)
}
   0x8   :  { %s470_s27 = scalar_lea.vmem %s20_s19, 2048  ;;  %p475_p4 = scmp.lt.s32.totalorder %s20_s19, %s20_s19 }
   0x9   :  { %p471_p3 = scmp.ne.s32.totalorder %s20_s19, %s470_s27  ;;  %p476_p5 = scmp.lt.s32.totalorder %s470_s27, %s470_s27 }
   0xb   :  { %p477_p6 = por %p476_p5, %p475_p4 }
   0xd   :  { %p478_p7 = pnand %p477_p6, %p471_p3 }
   0xf   :  { %481 = shalt.err (!%p478_p7)
}
  0x10   :  { %s509_s28 = smov 64   ;;  %s510_s29 = smov 4  }
  0x11   :  { %25 = dma.hbm_to_vmem [thread:$0]  %s611_s1, 2048, %s20_s19, [#allocation3], %s509_s28, %s509_s28, %s510_s29  }
  0x12   :  { %504 = dma.done.wait [#allocation3], 2048  }
  0x13   :  { %505 = vsyncadd [#allocation3], 4294965248  ;;  %v511_v0 = vmov 0.0   ;;  %v434_v1 = vld [vmem:[#allocation2 + $0x40] sm:$0xff]   ;;  %v436_v3 = vld [vmem:[#allocation2 + $0x48] sm:$0xff]   ;;  %vm512_vm0 = vmmov 0  }
  0x14   :  { %408 = vmatprep.subr.bf16.mxu1 %v511_v0  ;;  %v435_v2 = vld [vmem:[#allocation2] sm:$0xff]   ;;  %377 = vmatprep.subr.bf16.mxu0 %v434_v1  ;;  %v437_v4 = vld [vmem:[#allocation2 + $0x8] sm:$0xff]   ;;  %v438_v5 = vld [vmem:[#allocation2 + $0x50] sm:$0xff]   ;;  %vm332_vm1 = vcmask 523264  }
  0x15   :  { %378 = vmatpush3.bf16.msra.mxu0 %v435_v2  ;;  %v439_v6 = vld [vmem:[#allocation2 + $0x10] sm:$0xff]   ;;  %v440_v7 = vld [vmem:[#allocation2 + $0x58] sm:$0xff]   ;;  %v442_v9 = vld [vmem:[#allocation2 + $0x60] sm:$0xff]   ;;  %424 = vmatprep.mubr.msk.bf16.mxu1 %vm512_vm0, %v511_v0 }
  0x16   :  { %379 = vmatprep.subr.bf16.mxu0 %v436_v3  ;;  %v441_v8 = vld [vmem:[#allocation2 + $0x18] sm:$0xff]   ;;  %v443_v10 = vld [vmem:[#allocation2 + $0x20] sm:$0xff]   ;;  %v444_v11 = vld [vmem:[#allocation2 + $0x68] sm:$0xff]  }
  0x17   :  { %v36_v12 = vld [vmem:[%s610_s0] sm:$0xff]  ;;  %v445_v15 = vld [vmem:[#allocation2 + $0x28] sm:$0xff]   ;;  %v446_v16 = vld [vmem:[#allocation2 + $0x70] sm:$0xff]  }
  0x18   :  { %v351_v13 = vcombine.high %v36_v12, %v36_v12  ;;  %v452_v14 = vld [vmem:[%s613_s3] sm:$0xff]   ;;  %v453_v17 = vld [vmem:[%s613_s3 + $0x8] sm:$0xff]   ;;  %v447_v18 = vld [vmem:[#allocation2 + $0x30] sm:$0xff]   ;;  %v350_v23 = vcombine.low %v36_v12, %v36_v12 }
  0x19   :  { %380 = vmatpush3.bf16.msra.mxu0 %v437_v4  ;;  %409 = vmatpush3.bf16.msra.mxu1 %v452_v14  ;;  %v448_v19 = vld [vmem:[#allocation2 + $0x78] sm:$0xff]   ;;  %v454_v20 = vld [vmem:[%s613_s3 + $0x10] sm:$0xff]   ;;  %v456_v24 = vld [vmem:[%s613_s3 + $0x20] sm:$0xff]  }
  0x1a   :  { %381 = vmatprep.subr.bf16.mxu0 %v438_v5  ;;  %211 = vmatprep.mubr.bf16.mxu0 %v351_v13  ;;  %v449_v21 = vld [vmem:[#allocation2 + $0x38] sm:$0xff]   ;;  %v457_v25 = vld [vmem:[%s613_s3 + $0x28] sm:$0xff]   ;;  %v458_v26 = vld [vmem:[%s613_s3 + $0x30] sm:$0xff]  }
  0x1b   :  { %410 = vmatprep.subr.bf16.mxu1 %v511_v0  ;;  %v455_v22 = vld [vmem:[%s613_s3 + $0x18] sm:$0xff]   ;;  %v349_v29 = vld [vmem:[%s612_s2] ss:$0 sm:$0xff] }
  0x1c   :  { %v459_v27 = vld [vmem:[%s613_s3 + $0x38] sm:$0xff]   ;;  %v368_v37 = vld [vmem:[%s614_s4] ss:$0 sm:$0xff]  ;;  %s513_s3 = smov [#allocation5]  }
  0x1d   :  { %382 = vmatpush3.bf16.msra.mxu0 %v439_v6  ;;  %411 = vmatpush3.bf16.msra.mxu1 %v453_v17  ;;  %s340_s27 = sshll.u32 %s513_s3, 4  ;;  %s341_s27 = int_to_ptr.vmem [resolvable:$true] %s340_s27 }
  0x1e   :  { %383 = vmatprep.subr.bf16.mxu0 %v440_v7  ;;  %412 = vmatprep.subr.bf16.mxu1 %v511_v0  ;;  %s482_s2 = scalar_lea.vmem %s341_s27, 128  ;;  %p487_p9 = scmp.lt.s32.totalorder %s341_s27, %s341_s27 }
  0x1f   :  { %p483_p8 = scmp.ne.s32.totalorder %s341_s27, %s482_s2  ;;  %p488_p10 = scmp.lt.s32.totalorder %s482_s2, %s482_s2 }
  0x21   :  { %384 = vmatpush3.bf16.msra.mxu0 %v441_v8  ;;  %413 = vmatpush3.bf16.msra.mxu1 %v454_v20  ;;  %p489_p11 = por %p488_p10, %p487_p9 }
  0x22   :  { %385 = vmatprep.subr.bf16.mxu0 %v442_v9  ;;  %414 = vmatprep.subr.bf16.mxu1 %v511_v0 }
  0x23   :  { %p490_p12 = pnand %p489_p11, %p483_p8 }
  0x25   :  { %386 = vmatpush3.bf16.msra.mxu0 %v443_v10  ;;  %415 = vmatpush3.bf16.msra.mxu1 %v455_v22 }
  0x26   :  { %387 = vmatprep.subr.bf16.mxu0 %v444_v11  ;;  %416 = vmatprep.subr.bf16.mxu1 %v511_v0 }
  0x29   :  { %388 = vmatpush3.bf16.msra.mxu0 %v445_v15  ;;  %417 = vmatpush3.bf16.msra.mxu1 %v456_v24 }
  0x2a   :  { %389 = vmatprep.subr.bf16.mxu0 %v446_v16  ;;  %418 = vmatprep.subr.bf16.mxu1 %v511_v0 }
  0x2d   :  { %390 = vmatpush3.bf16.msra.mxu0 %v447_v18  ;;  %419 = vmatpush3.bf16.msra.mxu1 %v457_v25 }
  0x2e   :  { %391 = vmatprep.subr.bf16.mxu0 %v448_v19  ;;  %420 = vmatprep.subr.bf16.mxu1 %v511_v0 }
  0x31   :  { %392 = vmatpush3.bf16.msra.mxu0 %v449_v21  ;;  %421 = vmatpush3.bf16.msra.mxu1 %v458_v26 }
  0x32   :  { %422 = vmatprep.subr.bf16.mxu1 %v511_v0 }
  0x34   :  { %212 = vmatmul.mubr.bf16.vlgmr.msra.gmra.mrb[0].mxu0 %v350_v23 }
  0x35   :  { %423 = vmatpush3.bf16.msra.mxu1 %v459_v27 }
 0x107   :  { %v393_v28 = vpop.f32.mrb[0].mxu0 }
 0x108   :  { %v394_v30 = vpop.f32.mrb[1].mxu0 }
 0x109   :  { %v395_v31 = vadd.f32 %v394_v30, %v393_v28  ;;  %v396_v32 = vpop.f32.mrb[2].mxu0 }
 0x10a   :  { %v397_v33 = vpop.f32.mrb[3].mxu0 }
 0x10b   :  { %v214_v34 = vadd.f32 %v395_v31, %v349_v29 }
 0x10d   :  { %v219_v35 = vmax.f32 %v214_v34, 0.0 }
 0x10f   :  { %v220_v36 = vpack.c.bf16 %v219_v35, %v219_v35 }
 0x111   :  { %425 = vmatmul.mubr.bf16.vlgmr.msra.gmra.mrb[0].mxu1 %v220_v36 }
 0x1e4   :  { %v326_v38 = vpop.f32.mrb[0].mxu1 }
 0x1e5   :  { %v327_v39 = vadd.f32 %v368_v37, %v326_v38  ;;  %v426_v40 = vpop.f32.mrb[1].mxu1 }
 0x1e6   :  { %v329_v41 = vpop.f32.mrb[2].mxu1 }
 0x1e7   :  { %v427_v42 = vpop.f32.mrb[3].mxu1  ;;  %333 = vst.msk [vmem:[#allocation5] sm:$0xff] %vm332_vm1, %v327_v39 }
 0x1e8   :  { %493 = shalt.err (!%p490_p12)
}
 0x1e9   :  { %s494_s4 = scalar_lea.hbm %s615_s5, 128 }
 0x1ea   :  { %p495_p13 = scmp.ne.s32.totalorder %s615_s5, %s494_s4  ;;  %p498_p0 = scmp.lt.u32.totalorder %s494_s4, %s615_s5 }
 0x1ec   :  { %p500_p1 = pnand %p498_p0, %p495_p13 }
 0x1ee   :  { %503 = shalt.err (!%p500_p1)
}
 0x1ef   :  { %343 = dma.vmem_to_hbm [thread:$0]  %s341_s27, 128, %s615_s5, [#allocation4]  }
 0x1f0   :  { %506 = dma.done.wait [#allocation4], 128  }
 0x1f1   :  { %507 = vsyncadd [#allocation4], 4294967168 }
 0x1f2   :  { %347 = vsyncpa [#allocation3], 1 }
 0x1f3   :  { %348 = vsyncpa [#allocation4], 1 }

</bundles_post_ra>
